<compile_context>
chip_gen: v6e
topology: v6e:2x2x1
jax: 0.10.0
libtpu: 0.0.40
codegen_flags: <defaults>
</compile_context>

<pallas_src>
import functools

import jax
import jax.numpy as jnp
from jax.experimental import pallas as pl
from jax.experimental.pallas import tpu as pltpu


def _round_up(x, m):
    return ((x + m - 1) // m) * m


def _visual_mlp_kernel(x_ref, w1_ref, b1_ref, w3_ref, b3_ref,
                       gamma_ref, beta_ref, w2_ref, b2_ref, o_ref, *, eps):
    # x tile -> bf16 MXU operand (weights arrive already in bf16).
    xb = x_ref[...].astype(jnp.bfloat16)

    # Gate / up projections: bf16 x bf16 -> f32 accumulation, bias add in f32.
    h1 = jnp.dot(xb, w1_ref[...], preferred_element_type=jnp.float32) + b1_ref[...]
    h3 = jnp.dot(xb, w3_ref[...], preferred_element_type=jnp.float32) + b3_ref[...]

    # SwiGLU gate in f32 (sigmoid goes to the EUP, muls on the VPU).
    g = (h1 * jax.nn.sigmoid(h1)) * h3

    # LayerNorm over the intermediate dim (f32), with the affine folded into a
    # single fused scale/shift: y = g * s + (beta - mean * s), s = gamma*rsqrt.
    mean = jnp.mean(g, axis=-1, keepdims=True)
    var = jnp.mean(jnp.square(g - mean), axis=-1, keepdims=True)
    s = gamma_ref[...] * jax.lax.rsqrt(var + eps)
    y = g * s + (beta_ref[...] - mean * s)

    # Down projection: bf16 operands, f32 accumulation, bias in f32.
    out = jnp.dot(y.astype(jnp.bfloat16), w2_ref[...],
                  preferred_element_type=jnp.float32) + b2_ref[...]
    o_ref[...] = out.astype(o_ref.dtype)


def _make_specs(tm, H, I, weight_mode):
    def wspec(shape):
        if weight_mode is None:
            return pl.BlockSpec(shape, lambda i: (0, 0))
        return pl.BlockSpec(shape, lambda i: (0, 0), pipeline_mode=weight_mode)

    in_specs = [
        pl.BlockSpec((tm, H), lambda i: (i, 0)),   # x row tile
        wspec((H, I)), wspec((1, I)),              # W1^T, b1
        wspec((H, I)), wspec((1, I)),              # W3^T, b3
        wspec((1, I)), wspec((1, I)),              # LN gamma, beta
        wspec((I, H)), wspec((1, H)),              # W2^T, b2
    ]
    out_specs = pl.BlockSpec((tm, H), lambda i: (i, 0))
    return in_specs, out_specs


def _vmem_limit_bytes(tm, H, I, x_itemsize, out_itemsize, weight_buffers):
    weights = (2 * H * I + I * H) * 2 * weight_buffers         # bf16 weights
    small = (3 * I + H) * 4 * weight_buffers                   # biases + LN params (f32)
    io = 2 * tm * H * x_itemsize + 2 * tm * H * out_itemsize   # double-buffered x / out tiles
    temps = 6 * tm * I * 4                                     # live f32 (tm, I) intermediates
    est = weights + small + io + temps
    # 25% headroom, 8 MiB floor for compiler scratch, 64 MiB cap (v7x-safe).
    return int(min(max(est * 5 // 4, 8 << 20), 64 << 20))


def visual_mlp(hidden_states, kparams, *, eps=1e-6, tm=256):
    """hidden_states: (B, S, H).  kparams: prepare_kernel_params(init_params(...))."""
    B, S, H = hidden_states.shape
    M = B * S

    w1_t, w3_t, w2_t = kparams["w1_t"], kparams["w3_t"], kparams["w2_t"]
    b1, b3, b2 = kparams["b1"], kparams["b3"], kparams["b2"]
    gamma, beta = kparams["ln_g"], kparams["ln_b"]
    I = w1_t.shape[1]

    # Row tile: multiple of 8 sublanes, no larger than the padded token count.
    tm = max(8, min(_round_up(tm, 8), _round_up(M, 8)))
    m_pad = _round_up(M, tm)

    x2d = hidden_states.reshape(M, H)
    if m_pad != M:
        x2d = jnp.pad(x2d, ((0, m_pad - M), (0, 0)))

    kernel = functools.partial(_visual_mlp_kernel, eps=eps)
    args = (x2d, w1_t, b1, w3_t, b3, gamma, beta, w2_t, b2)

    def build(weight_mode, weight_buffers):
        in_specs, out_specs = _make_specs(tm, H, I, weight_mode)
        return pl.pallas_call(
            kernel,
            out_shape=jax.ShapeDtypeStruct((m_pad, H), hidden_states.dtype),
            grid_spec=pltpu.PrefetchScalarGridSpec(
                num_scalar_prefetch=0,
                grid=(m_pad // tm,),
                in_specs=in_specs,
                out_specs=out_specs,
            ),
            compiler_params=pltpu.CompilerParams(
                dimension_semantics=("parallel",),
                vmem_limit_bytes=_vmem_limit_bytes(
                    tm, H, I, x2d.dtype.itemsize,
                    jnp.dtype(hidden_states.dtype).itemsize, weight_buffers),
            ),
        )

    try:
        # Preferred: grid-invariant operands single-buffered (halves weight VMEM).
        out2d = build(pl.Buffered(1), 1)(*args)
    except Exception:
        # Fallback: default (double) buffering if Buffered(1) is rejected.
        out2d = build(None, 2)(*args)

    if m_pad != M:
        out2d = out2d[:M]
    return out2d.reshape(B, S, H)


def init_params(key, hidden_size, intermediate_size):
    """PyTorch-layout f32 params (nn.Linear weight is (out_features, in_features))."""
    ks = jax.random.split(key, 6)
    scale_h = 1.0 / jnp.sqrt(hidden_size)
    scale_i = 1.0 / jnp.sqrt(intermediate_size)
    return {
        "w1_w": jax.random.uniform(ks[0], (intermediate_size, hidden_size),
                                   jnp.float32, -scale_h, scale_h),
        "w1_b": jax.random.uniform(ks[1], (intermediate_size,),
                                   jnp.float32, -scale_h, scale_h),
        "w3_w": jax.random.uniform(ks[2], (intermediate_size, hidden_size),
                                   jnp.float32, -scale_h, scale_h),
        "w3_b": jax.random.uniform(ks[3], (intermediate_size,),
                                   jnp.float32, -scale_h, scale_h),
        "w2_w": jax.random.uniform(ks[4], (hidden_size, intermediate_size),
                                   jnp.float32, -scale_i, scale_i),
        "w2_b": jax.random.uniform(ks[5], (hidden_size,),
                                   jnp.float32, -scale_i, scale_i),
        "ln_g": jnp.ones((intermediate_size,), jnp.float32),
        "ln_b": jnp.zeros((intermediate_size,), jnp.float32),
    }


def prepare_kernel_params(params):
    """One-time conversion to kernel layout: pre-transposed bf16 weights, 2-D f32 biases."""
    return {
        "w1_t": params["w1_w"].T.astype(jnp.bfloat16),   # (H, I)
        "w3_t": params["w3_w"].T.astype(jnp.bfloat16),   # (H, I)
        "w2_t": params["w2_w"].T.astype(jnp.bfloat16),   # (I, H)
        "b1": params["w1_b"].reshape(1, -1).astype(jnp.float32),
        "b3": params["w3_b"].reshape(1, -1).astype(jnp.float32),
        "b2": params["w2_b"].reshape(1, -1).astype(jnp.float32),
        "ln_g": params["ln_g"].reshape(1, -1).astype(jnp.float32),
        "ln_b": params["ln_b"].reshape(1, -1).astype(jnp.float32),
    }


def visual_mlp_ref(hidden_states, params, *, eps=1e-6):
    """Pure-f32 reference matching the PyTorch module."""
    x = hidden_states
    h1 = x @ params["w1_w"].T + params["w1_b"]
    h3 = x @ params["w3_w"].T + params["w3_b"]
    g = jax.nn.silu(h1) * h3
    mean = jnp.mean(g, axis=-1, keepdims=True)
    var = jnp.mean(jnp.square(g - mean), axis=-1, keepdims=True)
    y = (g - mean) * jax.lax.rsqrt(var + eps) * params["ln_g"] + params["ln_b"]
    return y @ params["w2_w"].T + params["w2_b"]


def visual_mlp_ref_mixed(hidden_states, kparams, *, eps=1e-6):
    """Reference with the same bf16-operand / f32-accumulation recipe as the kernel."""
    B, S, H = hidden_states.shape
    xb = hidden_states.reshape(B * S, H).astype(jnp.bfloat16)
    h1 = jnp.dot(xb, kparams["w1_t"], preferred_element_type=jnp.float32) + kparams["b1"]
    h3 = jnp.dot(xb, kparams["w3_t"], preferred_element_type=jnp.float32) + kparams["b3"]
    g = (h1 * jax.nn.sigmoid(h1)) * h3
    mean = jnp.mean(g, axis=-1, keepdims=True)
    var = jnp.mean(jnp.square(g - mean), axis=-1, keepdims=True)
    y = (g - mean) * jax.lax.rsqrt(var + eps) * kparams["ln_g"] + kparams["ln_b"]
    out = jnp.dot(y.astype(jnp.bfloat16), kparams["w2_t"],
                  preferred_element_type=jnp.float32) + kparams["b2"]
    return out.reshape(B, S, H)


if __name__ == "__main__":
    key = jax.random.PRNGKey(0)
    kp, kx = jax.random.split(key)

    batch, seq, hidden, intermediate = 2, 8, 32, 64
    eps = 1e-6

    params = init_params(kp, hidden, intermediate)      # PyTorch-layout f32 params
    kparams = prepare_kernel_params(params)             # transposed + bf16, done once
    x = jax.random.normal(kx, (batch, seq, hidden), jnp.float32)

    out = jax.block_until_ready(visual_mlp(x, kparams, eps=eps, tm=256))
    assert out.shape == (batch, seq, hidden)

    # Tight check against a reference using the kernel's exact precision recipe.
    ref_mixed = visual_mlp_ref_mixed(x, kparams, eps=eps)
    assert jnp.allclose(out, ref_mixed, atol=1e-3, rtol=1e-3), \
        float(jnp.max(jnp.abs(out - ref_mixed)))

    # Looser sanity check vs. the pure-f32 PyTorch-equivalent reference
    # (difference is only bf16 weight/operand quantization).
    ref_f32 = visual_mlp_ref(x, params, eps=eps)
    assert jnp.allclose(out, ref_f32, atol=5e-2, rtol=5e-2), \
        float(jnp.max(jnp.abs(out - ref_f32)))

    print("KERNEL_OK")
</pallas_src>

<mosaic_0001>
module attributes {stable_mosaic.version = 11 : i64} {
  func.func @_visual_mlp_kernel(%arg0: i32, %arg1: memref<16x32xf32, #tpu.memory_space<vmem>>, %arg2: memref<32x64xbf16, #tpu.memory_space<vmem>>, %arg3: memref<1x64xf32, #tpu.memory_space<vmem>>, %arg4: memref<32x64xbf16, #tpu.memory_space<vmem>>, %arg5: memref<1x64xf32, #tpu.memory_space<vmem>>, %arg6: memref<1x64xf32, #tpu.memory_space<vmem>>, %arg7: memref<1x64xf32, #tpu.memory_space<vmem>>, %arg8: memref<64x32xbf16, #tpu.memory_space<vmem>>, %arg9: memref<1x32xf32, #tpu.memory_space<vmem>>, %arg10: memref<16x32xf32, #tpu.memory_space<vmem>>) attributes {dimension_semantics = [#tpu.dimension_semantics<parallel>], iteration_bounds = array<i64: 1>, scalar_prefetch = 0 : i64, scratch_operands = 0 : i64, tpu.core_type = #tpu.core_type<tc>, window_params = [{transform_indices = @transform_0, window_bounds = array<i64: 16, 32>}, {pipeline_mode = #tpu.pipeline_mode<synchronous>, transform_indices = @transform_1, window_bounds = array<i64: 32, 64>}, {pipeline_mode = #tpu.pipeline_mode<synchronous>, transform_indices = @transform_2, window_bounds = array<i64: 1, 64>}, {pipeline_mode = #tpu.pipeline_mode<synchronous>, transform_indices = @transform_3, window_bounds = array<i64: 32, 64>}, {pipeline_mode = #tpu.pipeline_mode<synchronous>, transform_indices = @transform_4, window_bounds = array<i64: 1, 64>}, {pipeline_mode = #tpu.pipeline_mode<synchronous>, transform_indices = @transform_5, window_bounds = array<i64: 1, 64>}, {pipeline_mode = #tpu.pipeline_mode<synchronous>, transform_indices = @transform_6, window_bounds = array<i64: 1, 64>}, {pipeline_mode = #tpu.pipeline_mode<synchronous>, transform_indices = @transform_7, window_bounds = array<i64: 64, 32>}, {pipeline_mode = #tpu.pipeline_mode<synchronous>, transform_indices = @transform_8, window_bounds = array<i64: 1, 32>}, {transform_indices = @transform_9, window_bounds = array<i64: 16, 32>}]} {
    %c0 = arith.constant 0 : index
    %c0_0 = arith.constant 0 : index
    %0 = vector.load %arg1[%c0, %c0_0] : memref<16x32xf32, #tpu.memory_space<vmem>>, vector<16x32xf32>
    %1 = arith.truncf %0 : vector<16x32xf32> to vector<16x32xbf16>
    %c0_1 = arith.constant 0 : index
    %c0_2 = arith.constant 0 : index
    %2 = vector.load %arg2[%c0_1, %c0_2] : memref<32x64xbf16, #tpu.memory_space<vmem>>, vector<32x64xbf16>
    %cst = arith.constant dense<0.000000e+00> : vector<16x64xf32>
    %3 = tpu.matmul %1, %2, %cst {dimension_numbers = #tpu.dot_dimension_numbers<[1], [0], [0], [1], [0, 0, 1, 1], [], []>} : vector<16x32xbf16>, vector<32x64xbf16>, vector<16x64xf32> -> vector<16x64xf32>
    %c0_3 = arith.constant 0 : index
    %c0_4 = arith.constant 0 : index
    %4 = vector.load %arg3[%c0_3, %c0_4] : memref<1x64xf32, #tpu.memory_space<vmem>>, vector<1x64xf32>
    %5 = vector.broadcast %4 : vector<1x64xf32> to vector<16x64xf32>
    %6 = arith.addf %3, %5 : vector<16x64xf32>
    %c0_5 = arith.constant 0 : index
    %c0_6 = arith.constant 0 : index
    %7 = vector.load %arg4[%c0_5, %c0_6] : memref<32x64xbf16, #tpu.memory_space<vmem>>, vector<32x64xbf16>
    %cst_7 = arith.constant dense<0.000000e+00> : vector<16x64xf32>
    %8 = tpu.matmul %1, %7, %cst_7 {dimension_numbers = #tpu.dot_dimension_numbers<[1], [0], [0], [1], [0, 0, 1, 1], [], []>} : vector<16x32xbf16>, vector<32x64xbf16>, vector<16x64xf32> -> vector<16x64xf32>
    %c0_8 = arith.constant 0 : index
    %c0_9 = arith.constant 0 : index
    %9 = vector.load %arg5[%c0_8, %c0_9] : memref<1x64xf32, #tpu.memory_space<vmem>>, vector<1x64xf32>
    %10 = vector.broadcast %9 : vector<1x64xf32> to vector<16x64xf32>
    %11 = arith.addf %8, %10 : vector<16x64xf32>
    %12 = arith.negf %6 : vector<16x64xf32>
    %13 = math.exp %12 : vector<16x64xf32>
    %cst_10 = arith.constant 1.000000e+00 : f32
    %14 = vector.broadcast %cst_10 : f32 to vector<16x64xf32>
    %15 = arith.addf %14, %13 : vector<16x64xf32>
    %16 = arith.divf %14, %15 : vector<16x64xf32>
    %17 = arith.mulf %6, %16 : vector<16x64xf32>
    %18 = arith.mulf %17, %11 : vector<16x64xf32>
    %cst_11 = arith.constant dense<0.000000e+00> : vector<16xf32>
    %19 = vector.multi_reduction <add>, %18, %cst_11 [1] : vector<16x64xf32> to vector<16xf32>
    %20 = vector.shape_cast %19 : vector<16xf32> to vector<16x1xf32>
    %cst_12 = arith.constant 6.400000e+01 : f32
    %21 = vector.broadcast %cst_12 : f32 to vector<16x1xf32>
    %22 = arith.divf %20, %21 : vector<16x1xf32>
    %23 = vector.broadcast %22 : vector<16x1xf32> to vector<16x64xf32>
    %24 = arith.subf %18, %23 : vector<16x64xf32>
    %25 = arith.mulf %24, %24 : vector<16x64xf32>
    %cst_13 = arith.constant dense<0.000000e+00> : vector<16xf32>
    %26 = vector.multi_reduction <add>, %25, %cst_13 [1] : vector<16x64xf32> to vector<16xf32>
    %27 = vector.shape_cast %26 : vector<16xf32> to vector<16x1xf32>
    %cst_14 = arith.constant 6.400000e+01 : f32
    %28 = vector.broadcast %cst_14 : f32 to vector<16x1xf32>
    %29 = arith.divf %27, %28 : vector<16x1xf32>
    %c0_15 = arith.constant 0 : index
    %c0_16 = arith.constant 0 : index
    %30 = vector.load %arg6[%c0_15, %c0_16] : memref<1x64xf32, #tpu.memory_space<vmem>>, vector<1x64xf32>
    %cst_17 = arith.constant 9.99999997E-7 : f32
    %31 = vector.broadcast %cst_17 : f32 to vector<16x1xf32>
    %32 = arith.addf %29, %31 : vector<16x1xf32>
    %33 = math.rsqrt %32 : vector<16x1xf32>
    %34 = vector.broadcast %30 : vector<1x64xf32> to vector<16x64xf32>
    %35 = vector.broadcast %33 : vector<16x1xf32> to vector<16x64xf32>
    %36 = arith.mulf %34, %35 : vector<16x64xf32>
    %37 = arith.mulf %18, %36 : vector<16x64xf32>
    %c0_18 = arith.constant 0 : index
    %c0_19 = arith.constant 0 : index
    %38 = vector.load %arg7[%c0_18, %c0_19] : memref<1x64xf32, #tpu.memory_space<vmem>>, vector<1x64xf32>
    %39 = vector.broadcast %22 : vector<16x1xf32> to vector<16x64xf32>
    %40 = arith.mulf %39, %36 : vector<16x64xf32>
    %41 = vector.broadcast %38 : vector<1x64xf32> to vector<16x64xf32>
    %42 = arith.subf %41, %40 : vector<16x64xf32>
    %43 = arith.addf %37, %42 : vector<16x64xf32>
    %44 = arith.truncf %43 : vector<16x64xf32> to vector<16x64xbf16>
    %c0_20 = arith.constant 0 : index
    %c0_21 = arith.constant 0 : index
    %45 = vector.load %arg8[%c0_20, %c0_21] : memref<64x32xbf16, #tpu.memory_space<vmem>>, vector<64x32xbf16>
    %cst_22 = arith.constant dense<0.000000e+00> : vector<16x32xf32>
    %46 = tpu.matmul %44, %45, %cst_22 {dimension_numbers = #tpu.dot_dimension_numbers<[1], [0], [0], [1], [0, 0, 1, 1], [], []>} : vector<16x64xbf16>, vector<64x32xbf16>, vector<16x32xf32> -> vector<16x32xf32>
    %c0_23 = arith.constant 0 : index
    %c0_24 = arith.constant 0 : index
    %47 = vector.load %arg9[%c0_23, %c0_24] : memref<1x32xf32, #tpu.memory_space<vmem>>, vector<1x32xf32>
    %48 = vector.broadcast %47 : vector<1x32xf32> to vector<16x32xf32>
    %49 = arith.addf %46, %48 : vector<16x32xf32>
    %c0_25 = arith.constant 0 : index
    %c0_26 = arith.constant 0 : index
    %50 = vector.load %arg10[%c0_25, %c0_26] : memref<16x32xf32, #tpu.memory_space<vmem>>, vector<16x32xf32>
    tpu.vector_store %arg10[%c0_25, %c0_26], %49 {strides = array<i32>} : memref<16x32xf32, #tpu.memory_space<vmem>>, vector<16x32xf32>,
    return
  }
  func.func @transform_0(%arg0: i32) -> (i32, i32) {
    %c0_i32 = arith.constant 0 : i32
    %c0_i32_0 = arith.constant 0 : i32
    return %arg0, %c0_i32 : i32, i32
  }
  func.func @transform_1(%arg0: i32) -> (i32, i32) {
    %c0_i32 = arith.constant 0 : i32
    %c0_i32_0 = arith.constant 0 : i32
    %c0_i32_1 = arith.constant 0 : i32
    return %c0_i32, %c0_i32_0 : i32, i32
  }
  func.func @transform_2(%arg0: i32) -> (i32, i32) {
    %c0_i32 = arith.constant 0 : i32
    %c0_i32_0 = arith.constant 0 : i32
    %c0_i32_1 = arith.constant 0 : i32
    return %c0_i32, %c0_i32_0 : i32, i32
  }
  func.func @transform_3(%arg0: i32) -> (i32, i32) {
    %c0_i32 = arith.constant 0 : i32
    %c0_i32_0 = arith.constant 0 : i32
    %c0_i32_1 = arith.constant 0 : i32
    return %c0_i32, %c0_i32_0 : i32, i32
  }
  func.func @transform_4(%arg0: i32) -> (i32, i32) {
    %c0_i32 = arith.constant 0 : i32
    %c0_i32_0 = arith.constant 0 : i32
    %c0_i32_1 = arith.constant 0 : i32
    return %c0_i32, %c0_i32_0 : i32, i32
  }
  func.func @transform_5(%arg0: i32) -> (i32, i32) {
    %c0_i32 = arith.constant 0 : i32
    %c0_i32_0 = arith.constant 0 : i32
    %c0_i32_1 = arith.constant 0 : i32
    return %c0_i32, %c0_i32_0 : i32, i32
  }
  func.func @transform_6(%arg0: i32) -> (i32, i32) {
    %c0_i32 = arith.constant 0 : i32
    %c0_i32_0 = arith.constant 0 : i32
    %c0_i32_1 = arith.constant 0 : i32
    return %c0_i32, %c0_i32_0 : i32, i32
  }
  func.func @transform_7(%arg0: i32) -> (i32, i32) {
    %c0_i32 = arith.constant 0 : i32
    %c0_i32_0 = arith.constant 0 : i32
    %c0_i32_1 = arith.constant 0 : i32
    return %c0_i32, %c0_i32_0 : i32, i32
  }
  func.func @transform_8(%arg0: i32) -> (i32, i32) {
    %c0_i32 = arith.constant 0 : i32
    %c0_i32_0 = arith.constant 0 : i32
    %c0_i32_1 = arith.constant 0 : i32
    return %c0_i32, %c0_i32_0 : i32, i32
  }
  func.func @transform_9(%arg0: i32) -> (i32, i32) {
    %c0_i32 = arith.constant 0 : i32
    %c0_i32_0 = arith.constant 0 : i32
    return %arg0, %c0_i32 : i32, i32
  }
}

module attributes {stable_mosaic.version = 11 : i64} {
  func.func @_visual_mlp_kernel(%arg0: i32, %arg1: memref<16x32xf32, #tpu.memory_space<vmem>>, %arg2: memref<32x64xbf16, #tpu.memory_space<vmem>>, %arg3: memref<1x64xf32, #tpu.memory_space<vmem>>, %arg4: memref<32x64xbf16, #tpu.memory_space<vmem>>, %arg5: memref<1x64xf32, #tpu.memory_space<vmem>>, %arg6: memref<1x64xf32, #tpu.memory_space<vmem>>, %arg7: memref<1x64xf32, #tpu.memory_space<vmem>>, %arg8: memref<64x32xbf16, #tpu.memory_space<vmem>>, %arg9: memref<1x32xf32, #tpu.memory_space<vmem>>, %arg10: memref<16x32xf32, #tpu.memory_space<vmem>>) attributes {dimension_semantics = [#tpu.dimension_semantics<parallel>], iteration_bounds = array<i64: 1>, scalar_prefetch = 0 : i64, scratch_operands = 0 : i64, tpu.core_type = #tpu.core_type<tc>, window_params = [{transform_indices = @transform_0, window_bounds = array<i64: 16, 32>}, {pipeline_mode = #tpu.pipeline_mode<synchronous>, transform_indices = @transform_1, window_bounds = array<i64: 32, 64>}, {pipeline_mode = #tpu.pipeline_mode<synchronous>, transform_indices = @transform_2, window_bounds = array<i64: 1, 64>}, {pipeline_mode = #tpu.pipeline_mode<synchronous>, transform_indices = @transform_3, window_bounds = array<i64: 32, 64>}, {pipeline_mode = #tpu.pipeline_mode<synchronous>, transform_indices = @transform_4, window_bounds = array<i64: 1, 64>}, {pipeline_mode = #tpu.pipeline_mode<synchronous>, transform_indices = @transform_5, window_bounds = array<i64: 1, 64>}, {pipeline_mode = #tpu.pipeline_mode<synchronous>, transform_indices = @transform_6, window_bounds = array<i64: 1, 64>}, {pipeline_mode = #tpu.pipeline_mode<synchronous>, transform_indices = @transform_7, window_bounds = array<i64: 64, 32>}, {pipeline_mode = #tpu.pipeline_mode<synchronous>, transform_indices = @transform_8, window_bounds = array<i64: 1, 32>}, {transform_indices = @transform_9, window_bounds = array<i64: 16, 32>}]} {
    %c0 = arith.constant 0 : index
    %c0_0 = arith.constant 0 : index
    %0 = vector.load %arg1[%c0, %c0_0] : memref<16x32xf32, #tpu.memory_space<vmem>>, vector<16x32xf32>
    %1 = arith.truncf %0 : vector<16x32xf32> to vector<16x32xbf16>
    %c0_1 = arith.constant 0 : index
    %c0_2 = arith.constant 0 : index
    %2 = vector.load %arg2[%c0_1, %c0_2] : memref<32x64xbf16, #tpu.memory_space<vmem>>, vector<32x64xbf16>
    %cst = arith.constant dense<0.000000e+00> : vector<16x64xf32>
    %3 = tpu.matmul %1, %2, %cst {dimension_numbers = #tpu.dot_dimension_numbers<[1], [0], [0], [1], [0, 0, 1, 1], [], []>} : vector<16x32xbf16>, vector<32x64xbf16>, vector<16x64xf32> -> vector<16x64xf32>
    %c0_3 = arith.constant 0 : index
    %c0_4 = arith.constant 0 : index
    %4 = vector.load %arg3[%c0_3, %c0_4] : memref<1x64xf32, #tpu.memory_space<vmem>>, vector<1x64xf32>
    %5 = vector.broadcast %4 : vector<1x64xf32> to vector<16x64xf32>
    %6 = arith.addf %3, %5 : vector<16x64xf32>
    %c0_5 = arith.constant 0 : index
    %c0_6 = arith.constant 0 : index
    %7 = vector.load %arg4[%c0_5, %c0_6] : memref<32x64xbf16, #tpu.memory_space<vmem>>, vector<32x64xbf16>
    %cst_7 = arith.constant dense<0.000000e+00> : vector<16x64xf32>
    %8 = tpu.matmul %1, %7, %cst_7 {dimension_numbers = #tpu.dot_dimension_numbers<[1], [0], [0], [1], [0, 0, 1, 1], [], []>} : vector<16x32xbf16>, vector<32x64xbf16>, vector<16x64xf32> -> vector<16x64xf32>
    %c0_8 = arith.constant 0 : index
    %c0_9 = arith.constant 0 : index
    %9 = vector.load %arg5[%c0_8, %c0_9] : memref<1x64xf32, #tpu.memory_space<vmem>>, vector<1x64xf32>
    %10 = vector.broadcast %9 : vector<1x64xf32> to vector<16x64xf32>
    %11 = arith.addf %8, %10 : vector<16x64xf32>
    %12 = arith.negf %6 : vector<16x64xf32>
    %13 = math.exp %12 : vector<16x64xf32>
    %cst_10 = arith.constant 1.000000e+00 : f32
    %14 = vector.broadcast %cst_10 : f32 to vector<16x64xf32>
    %15 = arith.addf %14, %13 : vector<16x64xf32>
    %16 = arith.divf %14, %15 : vector<16x64xf32>
    %17 = arith.mulf %6, %16 : vector<16x64xf32>
    %18 = arith.mulf %17, %11 : vector<16x64xf32>
    %cst_11 = arith.constant dense<0.000000e+00> : vector<16xf32>
    %19 = vector.multi_reduction <add>, %18, %cst_11 [1] : vector<16x64xf32> to vector<16xf32>
    %20 = vector.shape_cast %19 : vector<16xf32> to vector<16x1xf32>
    %cst_12 = arith.constant 6.400000e+01 : f32
    %21 = vector.broadcast %cst_12 : f32 to vector<16x1xf32>
    %22 = arith.divf %20, %21 : vector<16x1xf32>
    %23 = vector.broadcast %22 : vector<16x1xf32> to vector<16x64xf32>
    %24 = arith.subf %18, %23 : vector<16x64xf32>
    %25 = arith.mulf %24, %24 : vector<16x64xf32>
    %cst_13 = arith.constant dense<0.000000e+00> : vector<16xf32>
    %26 = vector.multi_reduction <add>, %25, %cst_13 [1] : vector<16x64xf32> to vector<16xf32>
    %27 = vector.shape_cast %26 : vector<16xf32> to vector<16x1xf32>
    %cst_14 = arith.constant 6.400000e+01 : f32
    %28 = vector.broadcast %cst_14 : f32 to vector<16x1xf32>
    %29 = arith.divf %27, %28 : vector<16x1xf32>
    %c0_15 = arith.constant 0 : index
    %c0_16 = arith.constant 0 : index
    %30 = vector.load %arg6[%c0_15, %c0_16] : memref<1x64xf32, #tpu.memory_space<vmem>>, vector<1x64xf32>
    %cst_17 = arith.constant 9.99999997E-7 : f32
    %31 = vector.broadcast %cst_17 : f32 to vector<16x1xf32>
    %32 = arith.addf %29, %31 : vector<16x1xf32>
    %33 = math.rsqrt %32 : vector<16x1xf32>
    %34 = vector.broadcast %30 : vector<1x64xf32> to vector<16x64xf32>
    %35 = vector.broadcast %33 : vector<16x1xf32> to vector<16x64xf32>
    %36 = arith.mulf %34, %35 : vector<16x64xf32>
    %37 = arith.mulf %18, %36 : vector<16x64xf32>
    %c0_18 = arith.constant 0 : index
    %c0_19 = arith.constant 0 : index
    %38 = vector.load %arg7[%c0_18, %c0_19] : memref<1x64xf32, #tpu.memory_space<vmem>>, vector<1x64xf32>
    %39 = vector.broadcast %22 : vector<16x1xf32> to vector<16x64xf32>
    %40 = arith.mulf %39, %36 : vector<16x64xf32>
    %41 = vector.broadcast %38 : vector<1x64xf32> to vector<16x64xf32>
    %42 = arith.subf %41, %40 : vector<16x64xf32>
    %43 = arith.addf %37, %42 : vector<16x64xf32>
    %44 = arith.truncf %43 : vector<16x64xf32> to vector<16x64xbf16>
    %c0_20 = arith.constant 0 : index
    %c0_21 = arith.constant 0 : index
    %45 = vector.load %arg8[%c0_20, %c0_21] : memref<64x32xbf16, #tpu.memory_space<vmem>>, vector<64x32xbf16>
    %cst_22 = arith.constant dense<0.000000e+00> : vector<16x32xf32>
    %46 = tpu.matmul %44, %45, %cst_22 {dimension_numbers = #tpu.dot_dimension_numbers<[1], [0], [0], [1], [0, 0, 1, 1], [], []>} : vector<16x64xbf16>, vector<64x32xbf16>, vector<16x32xf32> -> vector<16x32xf32>
    %c0_23 = arith.constant 0 : index
    %c0_24 = arith.constant 0 : index
    %47 = vector.load %arg9[%c0_23, %c0_24] : memref<1x32xf32, #tpu.memory_space<vmem>>, vector<1x32xf32>
    %48 = vector.broadcast %47 : vector<1x32xf32> to vector<16x32xf32>
    %49 = arith.addf %46, %48 : vector<16x32xf32>
    %c0_25 = arith.constant 0 : index
    %c0_26 = arith.constant 0 : index
    %50 = vector.load %arg10[%c0_25, %c0_26] : memref<16x32xf32, #tpu.memory_space<vmem>>, vector<16x32xf32>
    tpu.vector_store %arg10[%c0_25, %c0_26], %49 {strides = array<i32>} : memref<16x32xf32, #tpu.memory_space<vmem>>, vector<16x32xf32>,
    return
  }
  func.func @transform_0(%arg0: i32) -> (i32, i32) {
    %c0_i32 = arith.constant 0 : i32
    %c0_i32_0 = arith.constant 0 : i32
    return %arg0, %c0_i32 : i32, i32
  }
  func.func @transform_1(%arg0: i32) -> (i32, i32) {
    %c0_i32 = arith.constant 0 : i32
    %c0_i32_0 = arith.constant 0 : i32
    %c0_i32_1 = arith.constant 0 : i32
    return %c0_i32, %c0_i32_0 : i32, i32
  }
  func.func @transform_2(%arg0: i32) -> (i32, i32) {
    %c0_i32 = arith.constant 0 : i32
    %c0_i32_0 = arith.constant 0 : i32
    %c0_i32_1 = arith.constant 0 : i32
    return %c0_i32, %c0_i32_0 : i32, i32
  }
  func.func @transform_3(%arg0: i32) -> (i32, i32) {
    %c0_i32 = arith.constant 0 : i32
    %c0_i32_0 = arith.constant 0 : i32
    %c0_i32_1 = arith.constant 0 : i32
    return %c0_i32, %c0_i32_0 : i32, i32
  }
  func.func @transform_4(%arg0: i32) -> (i32, i32) {
    %c0_i32 = arith.constant 0 : i32
    %c0_i32_0 = arith.constant 0 : i32
    %c0_i32_1 = arith.constant 0 : i32
    return %c0_i32, %c0_i32_0 : i32, i32
  }
  func.func @transform_5(%arg0: i32) -> (i32, i32) {
    %c0_i32 = arith.constant 0 : i32
    %c0_i32_0 = arith.constant 0 : i32
    %c0_i32_1 = arith.constant 0 : i32
    return %c0_i32, %c0_i32_0 : i32, i32
  }
  func.func @transform_6(%arg0: i32) -> (i32, i32) {
    %c0_i32 = arith.constant 0 : i32
    %c0_i32_0 = arith.constant 0 : i32
    %c0_i32_1 = arith.constant 0 : i32
    return %c0_i32, %c0_i32_0 : i32, i32
  }
  func.func @transform_7(%arg0: i32) -> (i32, i32) {
    %c0_i32 = arith.constant 0 : i32
    %c0_i32_0 = arith.constant 0 : i32
    %c0_i32_1 = arith.constant 0 : i32
    return %c0_i32, %c0_i32_0 : i32, i32
  }
  func.func @transform_8(%arg0: i32) -> (i32, i32) {
    %c0_i32 = arith.constant 0 : i32
    %c0_i32_0 = arith.constant 0 : i32
    %c0_i32_1 = arith.constant 0 : i32
    return %c0_i32, %c0_i32_0 : i32, i32
  }
  func.func @transform_9(%arg0: i32) -> (i32, i32) {
    %c0_i32 = arith.constant 0 : i32
    %c0_i32_0 = arith.constant 0 : i32
    return %arg0, %c0_i32 : i32, i32
  }
}

</mosaic_0001>

<bundles_post_ra>
// kernel: tpu_custom_call.1
= control target key start
LH: loop header
LB: loop body
LE: loop exit
PB: predicated region body
PF: predicated region fallthrough
CT: control target
= control target key end

     0   :  { %v441_v1 = vmov 0.0   ;;  %vm442_vm0 = vmmov 0   ;;  %vm60_vm1 = vcmask 261120   ;;  %s564_s0 = inlined_call_operand.vmem [shape: f32[16,32], index: 0, kind: input, shape index: {}]   ;;  %s565_s1 = inlined_call_operand.vmem [shape: bf16[32,64], index: 1, kind: input, shape index: {}]   ;;  %s566_s2 = inlined_call_operand.vmem [shape: f32[1,64], index: 2, kind: input, shape index: {}]   ;;  %s567_s3 = inlined_call_operand.vmem [shape: bf16[32,64], index: 3, kind: input, shape index: {}]   ;;  %s568_s4 = inlined_call_operand.vmem [shape: f32[1,64], index: 4, kind: input, shape index: {}]   ;;  %s569_s5 = inlined_call_operand.vmem [shape: f32[1,64], index: 5, kind: input, shape index: {}]   ;;  %s570_s6 = inlined_call_operand.vmem [shape: f32[1,64], index: 6, kind: input, shape index: {}]   ;;  %s571_s7 = inlined_call_operand.vmem [shape: bf16[64,32], index: 7, kind: input, shape index: {}]   ;;  %s572_s8 = inlined_call_operand.vmem [shape: f32[1,32], index: 8, kind: input, shape index: {}]   ;;  %s573_s9 = inlined_call_operand.hbm [shape: f32[16,32], index: 9, kind: output, shape index: {}]  }
   0x1   :  { %v399_v0 = vld [vmem:[%s565_s1 + $0x8] sm:$0xff]   ;;  %366 = vmatprep.subr.bf16.mxu1 %v441_v1  ;;  %v400_v2 = vld [vmem:[%s565_s1] sm:$0xff]   ;;  %382 = vmatprep.subr.bf16.mxu0 %v441_v1 }
   0x2   :  { %367 = vmatpush3.bf16.msra.mxu1 %v399_v0  ;;  %370 = vmatprep.mubr.msk.bf16.mxu1 %vm442_vm0, %v441_v1  ;;  %v34_v3 = vld [vmem:[%s564_s0] sm:$0xff]  ;;  %v35_v4 = vld [vmem:[%s564_s0 + $0x8] sm:$0xff] }
   0x3   :  { %368 = vmatprep.subr.bf16.mxu1 %v441_v1  ;;  %390 = vmatprep.mubr.msk.bf16.mxu0 %vm442_vm0, %v441_v1  ;;  %v401_v5 = vld [vmem:[%s567_s3 + $0x8] sm:$0xff]   ;;  %v36_v6 = vpack.c.bf16 %v35_v4, %v34_v3 }
   0x6   :  { %369 = vmatpush3.bf16.msra.mxu1 %v400_v2 }
   0x7   :  { %374 = vmatprep.subr.bf16.mxu1 %v441_v1 }
   0x8   :  { %14 = vsyncpa [#allocation3], 0  ;;  %v402_v7 = vld [vmem:[%s567_s3] sm:$0xff]   ;;  %vm185_vm2 = vcmask 523264   ;;  %v403_v46 = vld [vmem:[%s571_s7 + $0x18] sm:$0xff]   ;;  %s443_s11 = smov [#allocation2]  }
   0x9   :  { %371 = vmatmul.mubr.msk.bf16.vlgmr.msra.gmra.mxu1 %vm60_vm1, %v36_v6  ;;  %v337_v8 = vld [vmem:[%s566_s2] ss:$0 sm:$0xff]  ;;  %383 = vmatpush3.bf16.msra.mxu0 %v403_v46  ;;  %v404_v47 = vld [vmem:[%s571_s7 + $0x10] sm:$0xff]   ;;  %v405_v48 = vld [vmem:[%s571_s7 + $0x8] sm:$0xff]   ;;  %s326_s12 = sshll.u32 %s443_s11, 4  ;;  %s327_s12 = int_to_ptr.vmem [resolvable:$true] %s326_s12 }
   0xa   :  { %375 = vmatpush3.bf16.msra.mxu1 %v401_v5  ;;  %378 = vmatprep.mubr.msk.bf16.mxu1 %vm442_vm0, %v441_v1  ;;  %v341_v25 = vld [vmem:[%s568_s4] ss:$0 sm:$0xff]  ;;  %p424_p1 = scmp.lt.s32.totalorder %s327_s12, %s327_s12 }
   0xb   :  { %376 = vmatprep.subr.bf16.mxu1 %v441_v1  ;;  %384 = vmatprep.subr.bf16.mxu0 %v441_v1  ;;  %v406_v49 = vld [vmem:[%s571_s7] sm:$0xff]  }
   0xc   :  { %v347_v56 = vld [vmem:[%s569_s5] ss:$0 sm:$0xff] }
   0xd   :  { %385 = vmatpush3.bf16.msra.mxu0 %v404_v47  ;;  %v348_v61 = vld [vmem:[%s570_s6] ss:$0 sm:$0xff]  ;;  %s419_s6 = scalar_lea.vmem %s327_s12, 256 }
   0xe   :  { %377 = vmatpush3.bf16.msra.mxu1 %v402_v7  ;;  %386 = vmatprep.subr.bf16.mxu0 %v441_v1  ;;  %v349_v7 = vld [vmem:[%s572_s8] ss:$0 sm:$0xff]  ;;  %p420_p0 = scmp.ne.s32.totalorder %s327_s12, %s419_s6  ;;  %p425_p2 = scmp.lt.s32.totalorder %s419_s6, %s419_s6 }
  0x10   :  { %p426_p3 = por %p425_p2, %p424_p1 }
  0x11   :  { %379 = vmatmul.mubr.msk.bf16.vlgmr.msra.gmra.mxu1 %vm60_vm1, %v36_v6  ;;  %387 = vmatpush3.bf16.msra.mxu0 %v405_v48 }
  0x12   :  { %388 = vmatprep.subr.bf16.mxu0 %v441_v1  ;;  %p427_p4 = pnand %p426_p3, %p420_p0 }
  0x15   :  { %389 = vmatpush3.bf16.msra.mxu0 %v406_v49 }
  0xc9   :  { %v98_v9 = vpop.f32.mrf.mxu1 }
  0xca   :  { %v99_v10 = vadd.f32 %v337_v8, %v98_v9 }
  0xcb   :  { %v372_v11 = vpop.f32.mrf.mxu1 }
  0xcc   :  { %v345_v12 = vmul.f32 -1.442695, %v99_v10 }
  0xcd   :  { %v101_v13 = vpop.f32.mrf.mxu1 }
  0xce   :  { %407 = vpow2.f32 %v345_v12  ;;  %v102_v14 = vadd.f32 %v337_v8, %v101_v13 }
  0xcf   :  { %v373_v15 = vpop.f32.mrf.mxu1 }
  0xd0   :  { %v346_v16 = vmul.f32 -1.442695, %v102_v14 }
  0xd1   :  { %v162_v17 = vpop.f32.mrf.mxu1 }
  0xd2   :  { %409 = vpow2.f32 %v346_v16  ;;  %v163_v26 = vadd.f32 %v341_v25, %v162_v17 }
  0xd3   :  { %v380_v18 = vpop.f32.mrf.mxu1 }
  0xd5   :  { %v165_v19 = vpop.f32.mrf.mxu1 }
  0xd6   :  { %v166_v32 = vadd.f32 %v341_v25, %v165_v19 }
  0xd7   :  { %v381_v20 = vpop.f32.mrf.mxu1 }
  0xdb   :  { %v408_v21 = vpop.eup %407 }
  0xdc   :  { %v175_v22 = vadd.f32 1.0, %v408_v21 }
  0xde   :  { %411 = vrcp.f32 %v175_v22 }
  0xdf   :  { %v410_v23 = vpop.eup %409 }
  0xe0   :  { %v176_v24 = vadd.f32 1.0, %v410_v23 }
  0xe2   :  { %413 = vrcp.f32 %v176_v24 }
  0xeb   :  { %v412_v27 = vpop.eup %411 }
  0xec   :  { %v181_v28 = vmul.f32 %v412_v27, %v99_v10 }
  0xee   :  { %v183_v29 = vmul.f32 %v181_v28, %v163_v26 }
  0xef   :  { %v414_v30 = vpop.eup %413 }
  0xf0   :  { %v182_v31 = vmul.f32 %v414_v30, %v102_v14  ;;  %v186_v33 = vsel %vm185_vm2, %v183_v29, 0.0 }
  0xf1   :  { %187 = vadd.xlane.f32.xlu0 %v186_v33 }
  0xf2   :  { %v184_v34 = vmul.f32 %v182_v31, %v166_v32 }
  0xf4   :  { %v189_v35 = vsel %vm185_vm2, %v184_v34, 0.0 }
  0xf5   :  { %190 = vadd.xlane.f32.xlu0 %v189_v35 }
 0x17a   :  { %v188_v36 = vpop.xlane.xlu0 %187 }
 0x17b   :  { %v193_v37 = vmul.f32 0.015625, %v188_v36 }
 0x17d   :  { %v195_v38 = vsub.f32 %v183_v29, %v193_v37 }
 0x17e   :  { %v191_v39 = vpop.xlane.xlu0 %190 }
 0x17f   :  { %v194_v40 = vmul.f32 0.015625, %v191_v39  ;;  %v197_v41 = vmul.f32 %v195_v38, %v195_v38 }
 0x181   :  { %v196_v42 = vsub.f32 %v184_v34, %v194_v40  ;;  %v199_v43 = vsel %vm185_vm2, %v197_v41, 0.0 }
 0x182   :  { %200 = vadd.xlane.f32.xlu1 %v199_v43 }
 0x183   :  { %v198_v44 = vmul.f32 %v196_v42, %v196_v42 }
 0x185   :  { %v202_v45 = vsel %vm185_vm2, %v198_v44, 0.0 }
 0x186   :  { %203 = vadd.xlane.f32.xlu1 %v202_v45 }
 0x20b   :  { %v201_v50 = vpop.xlane.xlu1 %200 }
 0x20c   :  { %v205_v51 = vmul.f32 0.015625, %v201_v50 }
 0x20e   :  { %v208_v52 = vadd.f32 1e-06, %v205_v51 }
 0x20f   :  { %v204_v53 = vpop.xlane.xlu1 %203 }
 0x210   :  { %415 = vrsqrt.f32 %v208_v52  ;;  %v206_v54 = vmul.f32 0.015625, %v204_v53 }
 0x212   :  { %v209_v55 = vadd.f32 1e-06, %v206_v54 }
 0x214   :  { %417 = vrsqrt.f32 %v209_v55 }
 0x21d   :  { %v416_v57 = vpop.eup %415 }
 0x21e   :  { %v218_v58 = vmul.f32 %v416_v57, %v347_v56 }
 0x220   :  { %v223_v59 = vmul.f32 %v218_v58, %v193_v37  ;;  %v220_v1 = vmul.f32 %v218_v58, %v183_v29 }
 0x221   :  { %v418_v60 = vpop.eup %417 }
 0x222   :  { %v219_v62 = vmul.f32 %v418_v60, %v347_v56  ;;  %v231_v0 = vsub.f32 %v348_v61, %v223_v59 }
 0x224   :  { %v224_v63 = vmul.f32 %v219_v62, %v194_v40  ;;  %v221_v2 = vmul.f32 %v219_v62, %v184_v34  ;;  %v233_v4 = vadd.f32 %v231_v0, %v220_v1 }
 0x226   :  { %v232_v3 = vsub.f32 %v348_v61, %v224_v63 }
 0x228   :  { %v234_v5 = vadd.f32 %v232_v3, %v221_v2 }
 0x22a   :  { %v235_v6 = vpack.c.bf16 %v234_v5, %v233_v4 }
 0x22c   :  { %391 = vmatmul.mubr.msk.bf16.vlgmr.msra.gmra.mxu0 %vm185_vm2, %v235_v6 }
 0x2ec   :  { %v312_v8 = vpop.f32.mrf.mxu0 }
 0x2ed   :  { %v313_v9 = vadd.f32 %v349_v7, %v312_v8 }
 0x2ee   :  { %v392_v10 = vpop.f32.mrf.mxu0 }
 0x2ef   :  { %319 = vst.msk [vmem:[#allocation2] sm:$0xff] %vm60_vm1, %v313_v9 }
 0x2f0   :  { %v315_v11 = vpop.f32.mrf.mxu0 }
 0x2f1   :  { %v316_v12 = vadd.f32 %v349_v7, %v315_v11 }
 0x2f2   :  { %v393_v13 = vpop.f32.mrf.mxu0 }
 0x2f3   :  { %320 = vst.msk [vmem:[#allocation2 + $0x8] sm:$0xff] %vm60_vm1, %v316_v12 }
 0x2f4   :  { %430 = shalt.err (!%p427_p4)
}
 0x2f5   :  { %s444_s8 = smov 128   ;;  %s445_s13 = smov 8  }
 0x2f6   :  { %332 = dma.vmem_to_hbm [thread:$0]  %s327_s12, 256, %s573_s9, [#allocation3], %s444_s8, %s444_s8, %s445_s13  }
 0x2f7   :  { %439 = dma.done.wait [#allocation3], 256  }
 0x2f8   :  { %440 = vsyncadd [#allocation3], 4294967040 }
 0x2f9   :  { %336 = vsyncpa [#allocation3], 1 }

// kernel: tpu_custom_call.1
= control target key start
LH: loop header
LB: loop body
LE: loop exit
PB: predicated region body
PF: predicated region fallthrough
CT: control target
= control target key end

     0   :  { %v441_v1 = vmov 0.0   ;;  %vm442_vm0 = vmmov 0   ;;  %vm60_vm1 = vcmask 261120   ;;  %s564_s0 = inlined_call_operand.vmem [shape: f32[16,32], index: 0, kind: input, shape index: {}]   ;;  %s565_s1 = inlined_call_operand.vmem [shape: bf16[32,64], index: 1, kind: input, shape index: {}]   ;;  %s566_s2 = inlined_call_operand.vmem [shape: f32[1,64], index: 2, kind: input, shape index: {}]   ;;  %s567_s3 = inlined_call_operand.vmem [shape: bf16[32,64], index: 3, kind: input, shape index: {}]   ;;  %s568_s4 = inlined_call_operand.vmem [shape: f32[1,64], index: 4, kind: input, shape index: {}]   ;;  %s569_s5 = inlined_call_operand.vmem [shape: f32[1,64], index: 5, kind: input, shape index: {}]   ;;  %s570_s6 = inlined_call_operand.vmem [shape: f32[1,64], index: 6, kind: input, shape index: {}]   ;;  %s571_s7 = inlined_call_operand.vmem [shape: bf16[64,32], index: 7, kind: input, shape index: {}]   ;;  %s572_s8 = inlined_call_operand.vmem [shape: f32[1,32], index: 8, kind: input, shape index: {}]   ;;  %s573_s9 = inlined_call_operand.hbm [shape: f32[16,32], index: 9, kind: output, shape index: {}]  }
   0x1   :  { %v399_v0 = vld [vmem:[%s565_s1 + $0x8] sm:$0xff]   ;;  %366 = vmatprep.subr.bf16.mxu1 %v441_v1  ;;  %v400_v2 = vld [vmem:[%s565_s1] sm:$0xff]   ;;  %382 = vmatprep.subr.bf16.mxu0 %v441_v1 }
   0x2   :  { %367 = vmatpush3.bf16.msra.mxu1 %v399_v0  ;;  %370 = vmatprep.mubr.msk.bf16.mxu1 %vm442_vm0, %v441_v1  ;;  %v34_v3 = vld [vmem:[%s564_s0] sm:$0xff]  ;;  %v35_v4 = vld [vmem:[%s564_s0 + $0x8] sm:$0xff] }
   0x3   :  { %368 = vmatprep.subr.bf16.mxu1 %v441_v1  ;;  %390 = vmatprep.mubr.msk.bf16.mxu0 %vm442_vm0, %v441_v1  ;;  %v401_v5 = vld [vmem:[%s567_s3 + $0x8] sm:$0xff]   ;;  %v36_v6 = vpack.c.bf16 %v35_v4, %v34_v3 }
   0x6   :  { %369 = vmatpush3.bf16.msra.mxu1 %v400_v2 }
   0x7   :  { %374 = vmatprep.subr.bf16.mxu1 %v441_v1 }
   0x8   :  { %14 = vsyncpa [#allocation3], 0  ;;  %v402_v7 = vld [vmem:[%s567_s3] sm:$0xff]   ;;  %vm185_vm2 = vcmask 523264   ;;  %v403_v46 = vld [vmem:[%s571_s7 + $0x18] sm:$0xff]   ;;  %s443_s11 = smov [#allocation2]  }
   0x9   :  { %371 = vmatmul.mubr.msk.bf16.vlgmr.msra.gmra.mxu1 %vm60_vm1, %v36_v6  ;;  %v337_v8 = vld [vmem:[%s566_s2] ss:$0 sm:$0xff]  ;;  %383 = vmatpush3.bf16.msra.mxu0 %v403_v46  ;;  %v404_v47 = vld [vmem:[%s571_s7 + $0x10] sm:$0xff]   ;;  %v405_v48 = vld [vmem:[%s571_s7 + $0x8] sm:$0xff]   ;;  %s326_s12 = sshll.u32 %s443_s11, 4  ;;  %s327_s12 = int_to_ptr.vmem [resolvable:$true] %s326_s12 }
   0xa   :  { %375 = vmatpush3.bf16.msra.mxu1 %v401_v5  ;;  %378 = vmatprep.mubr.msk.bf16.mxu1 %vm442_vm0, %v441_v1  ;;  %v341_v25 = vld [vmem:[%s568_s4] ss:$0 sm:$0xff]  ;;  %p424_p1 = scmp.lt.s32.totalorder %s327_s12, %s327_s12 }
   0xb   :  { %376 = vmatprep.subr.bf16.mxu1 %v441_v1  ;;  %384 = vmatprep.subr.bf16.mxu0 %v441_v1  ;;  %v406_v49 = vld [vmem:[%s571_s7] sm:$0xff]  }
   0xc   :  { %v347_v56 = vld [vmem:[%s569_s5] ss:$0 sm:$0xff] }
   0xd   :  { %385 = vmatpush3.bf16.msra.mxu0 %v404_v47  ;;  %v348_v61 = vld [vmem:[%s570_s6] ss:$0 sm:$0xff]  ;;  %s419_s6 = scalar_lea.vmem %s327_s12, 256 }
   0xe   :  { %377 = vmatpush3.bf16.msra.mxu1 %v402_v7  ;;  %386 = vmatprep.subr.bf16.mxu0 %v441_v1  ;;  %v349_v7 = vld [vmem:[%s572_s8] ss:$0 sm:$0xff]  ;;  %p420_p0 = scmp.ne.s32.totalorder %s327_s12, %s419_s6  ;;  %p425_p2 = scmp.lt.s32.totalorder %s419_s6, %s419_s6 }
  0x10   :  { %p426_p3 = por %p425_p2, %p424_p1 }
  0x11   :  { %379 = vmatmul.mubr.msk.bf16.vlgmr.msra.gmra.mxu1 %vm60_vm1, %v36_v6  ;;  %387 = vmatpush3.bf16.msra.mxu0 %v405_v48 }
  0x12   :  { %388 = vmatprep.subr.bf16.mxu0 %v441_v1  ;;  %p427_p4 = pnand %p426_p3, %p420_p0 }
  0x15   :  { %389 = vmatpush3.bf16.msra.mxu0 %v406_v49 }
  0xc9   :  { %v98_v9 = vpop.f32.mrf.mxu1 }
  0xca   :  { %v99_v10 = vadd.f32 %v337_v8, %v98_v9 }
  0xcb   :  { %v372_v11 = vpop.f32.mrf.mxu1 }
  0xcc   :  { %v345_v12 = vmul.f32 -1.442695, %v99_v10 }
  0xcd   :  { %v101_v13 = vpop.f32.mrf.mxu1 }
  0xce   :  { %407 = vpow2.f32 %v345_v12  ;;  %v102_v14 = vadd.f32 %v337_v8, %v101_v13 }
  0xcf   :  { %v373_v15 = vpop.f32.mrf.mxu1 }
  0xd0   :  { %v346_v16 = vmul.f32 -1.442695, %v102_v14 }
  0xd1   :  { %v162_v17 = vpop.f32.mrf.mxu1 }
  0xd2   :  { %409 = vpow2.f32 %v346_v16  ;;  %v163_v26 = vadd.f32 %v341_v25, %v162_v17 }
  0xd3   :  { %v380_v18 = vpop.f32.mrf.mxu1 }
  0xd5   :  { %v165_v19 = vpop.f32.mrf.mxu1 }
  0xd6   :  { %v166_v32 = vadd.f32 %v341_v25, %v165_v19 }
  0xd7   :  { %v381_v20 = vpop.f32.mrf.mxu1 }
  0xdb   :  { %v408_v21 = vpop.eup %407 }
  0xdc   :  { %v175_v22 = vadd.f32 1.0, %v408_v21 }
  0xde   :  { %411 = vrcp.f32 %v175_v22 }
  0xdf   :  { %v410_v23 = vpop.eup %409 }
  0xe0   :  { %v176_v24 = vadd.f32 1.0, %v410_v23 }
  0xe2   :  { %413 = vrcp.f32 %v176_v24 }
  0xeb   :  { %v412_v27 = vpop.eup %411 }
  0xec   :  { %v181_v28 = vmul.f32 %v412_v27, %v99_v10 }
  0xee   :  { %v183_v29 = vmul.f32 %v181_v28, %v163_v26 }
  0xef   :  { %v414_v30 = vpop.eup %413 }
  0xf0   :  { %v182_v31 = vmul.f32 %v414_v30, %v102_v14  ;;  %v186_v33 = vsel %vm185_vm2, %v183_v29, 0.0 }
  0xf1   :  { %187 = vadd.xlane.f32.xlu0 %v186_v33 }
  0xf2   :  { %v184_v34 = vmul.f32 %v182_v31, %v166_v32 }
  0xf4   :  { %v189_v35 = vsel %vm185_vm2, %v184_v34, 0.0 }
  0xf5   :  { %190 = vadd.xlane.f32.xlu0 %v189_v35 }
 0x17a   :  { %v188_v36 = vpop.xlane.xlu0 %187 }
 0x17b   :  { %v193_v37 = vmul.f32 0.015625, %v188_v36 }
 0x17d   :  { %v195_v38 = vsub.f32 %v183_v29, %v193_v37 }
 0x17e   :  { %v191_v39 = vpop.xlane.xlu0 %190 }
 0x17f   :  { %v194_v40 = vmul.f32 0.015625, %v191_v39  ;;  %v197_v41 = vmul.f32 %v195_v38, %v195_v38 }
 0x181   :  { %v196_v42 = vsub.f32 %v184_v34, %v194_v40  ;;  %v199_v43 = vsel %vm185_vm2, %v197_v41, 0.0 }
 0x182   :  { %200 = vadd.xlane.f32.xlu1 %v199_v43 }
 0x183   :  { %v198_v44 = vmul.f32 %v196_v42, %v196_v42 }
 0x185   :  { %v202_v45 = vsel %vm185_vm2, %v198_v44, 0.0 }
 0x186   :  { %203 = vadd.xlane.f32.xlu1 %v202_v45 }
 0x20b   :  { %v201_v50 = vpop.xlane.xlu1 %200 }
 0x20c   :  { %v205_v51 = vmul.f32 0.015625, %v201_v50 }
 0x20e   :  { %v208_v52 = vadd.f32 1e-06, %v205_v51 }
 0x20f   :  { %v204_v53 = vpop.xlane.xlu1 %203 }
 0x210   :  { %415 = vrsqrt.f32 %v208_v52  ;;  %v206_v54 = vmul.f32 0.015625, %v204_v53 }
 0x212   :  { %v209_v55 = vadd.f32 1e-06, %v206_v54 }
 0x214   :  { %417 = vrsqrt.f32 %v209_v55 }
 0x21d   :  { %v416_v57 = vpop.eup %415 }
 0x21e   :  { %v218_v58 = vmul.f32 %v416_v57, %v347_v56 }
 0x220   :  { %v223_v59 = vmul.f32 %v218_v58, %v193_v37  ;;  %v220_v1 = vmul.f32 %v218_v58, %v183_v29 }
 0x221   :  { %v418_v60 = vpop.eup %417 }
 0x222   :  { %v219_v62 = vmul.f32 %v418_v60, %v347_v56  ;;  %v231_v0 = vsub.f32 %v348_v61, %v223_v59 }
 0x224   :  { %v224_v63 = vmul.f32 %v219_v62, %v194_v40  ;;  %v221_v2 = vmul.f32 %v219_v62, %v184_v34  ;;  %v233_v4 = vadd.f32 %v231_v0, %v220_v1 }
 0x226   :  { %v232_v3 = vsub.f32 %v348_v61, %v224_v63 }
 0x228   :  { %v234_v5 = vadd.f32 %v232_v3, %v221_v2 }
 0x22a   :  { %v235_v6 = vpack.c.bf16 %v234_v5, %v233_v4 }
 0x22c   :  { %391 = vmatmul.mubr.msk.bf16.vlgmr.msra.gmra.mxu0 %vm185_vm2, %v235_v6 }
 0x2ec   :  { %v312_v8 = vpop.f32.mrf.mxu0 }
 0x2ed   :  { %v313_v9 = vadd.f32 %v349_v7, %v312_v8 }
 0x2ee   :  { %v392_v10 = vpop.f32.mrf.mxu0 }
 0x2ef   :  { %319 = vst.msk [vmem:[#allocation2] sm:$0xff] %vm60_vm1, %v313_v9 }
 0x2f0   :  { %v315_v11 = vpop.f32.mrf.mxu0 }
 0x2f1   :  { %v316_v12 = vadd.f32 %v349_v7, %v315_v11 }
 0x2f2   :  { %v393_v13 = vpop.f32.mrf.mxu0 }
 0x2f3   :  { %320 = vst.msk [vmem:[#allocation2 + $0x8] sm:$0xff] %vm60_vm1, %v316_v12 }
 0x2f4   :  { %430 = shalt.err (!%p427_p4)
}
 0x2f5   :  { %s444_s8 = smov 128   ;;  %s445_s13 = smov 8  }
 0x2f6   :  { %332 = dma.vmem_to_hbm [thread:$0]  %s327_s12, 256, %s573_s9, [#allocation3], %s444_s8, %s444_s8, %s445_s13  }
 0x2f7   :  { %439 = dma.done.wait [#allocation3], 256  }
 0x2f8   :  { %440 = vsyncadd [#allocation3], 4294967040 }
 0x2f9   :  { %336 = vsyncpa [#allocation3], 1 }

</bundles_post_ra>
